<compile_context>
chip_gen: v7x
topology: tpu7x:2x2x1
jax: 0.10.0
libtpu: 0.0.40
codegen_flags: <defaults>
</compile_context>

<pallas_src>
import functools

import jax
import jax.numpy as jnp
from jax import lax
from jax.experimental import pallas as pl
from jax.experimental.pallas import tpu as pltpu

MAX_NUM_STEPS = 1000
RTOL = 1e-3
ATOL = 1e-3

# ---- Dormand-Prince (dopri5) Butcher tableau ---------------------------------
A21 = 1.0 / 5.0
A31, A32 = 3.0 / 40.0, 9.0 / 40.0
A41, A42, A43 = 44.0 / 45.0, -56.0 / 15.0, 32.0 / 9.0
A51, A52, A53, A54 = 19372.0 / 6561.0, -25360.0 / 2187.0, 64448.0 / 6561.0, -212.0 / 729.0
A61, A62, A63, A64, A65 = (9017.0 / 3168.0, -355.0 / 33.0, 46732.0 / 5247.0,
                           49.0 / 176.0, -5103.0 / 18656.0)
B1, B3, B4, B5, B6 = 35.0 / 384.0, 500.0 / 1113.0, 125.0 / 192.0, -2187.0 / 6784.0, 11.0 / 84.0
# error coefficients = (5th order) - (4th order)
E1 = 35.0 / 384.0 - 5179.0 / 57600.0
E3 = 500.0 / 1113.0 - 7571.0 / 16695.0
E4 = 125.0 / 192.0 - 393.0 / 640.0
E5 = -2187.0 / 6784.0 + 92097.0 / 339200.0
E6 = 11.0 / 84.0 - 187.0 / 2100.0
E7 = -1.0 / 40.0


def _fused_dopri5_kernel(y0_ref, w1_ref, b1_ref, w2_ref, b2_ref, w3_ref, b3_ref,
                         y_out_ref, nsteps_ref, *, n_valid_rows):
    # Hoist weights once: at 32x32 each is ~4 vregs, total pressure well under
    # the 64-vreg file.  (For large hidden_dim, read from the refs inside f()
    # instead, so Mosaic issues vld-per-use and avoids hot-loop spills.)
    w1 = w1_ref[...]; b1 = b1_ref[...]
    w2 = w2_ref[...]; b2 = b2_ref[...]
    w3 = w3_ref[...]; b3 = b3_ref[...]

    def f(y):
        a1 = jnp.maximum(jnp.dot(y, w1, preferred_element_type=jnp.float32) + b1, 0.0)
        a2 = jnp.maximum(jnp.dot(a1, w2, preferred_element_type=jnp.float32) + b2, 0.0)
        return jnp.dot(a2, w3, preferred_element_type=jnp.float32) + b3

    y0 = y0_ref[...]
    bp, d = y0.shape
    inv_n_valid = jnp.float32(1.0 / (n_valid_rows * d))

    if n_valid_rows < bp:  # static branch: mask padded batch rows out of the error norm
        row_ids = lax.broadcasted_iota(jnp.int32, (bp, d), 0)
        pad_mask = (row_ids < n_valid_rows).astype(jnp.float32)
    else:
        pad_mask = None

    k1_0 = f(y0)  # initial FSAL derivative

    t_end = jnp.float32(1.0)

    def cond(state):
        t, _h, n, _y, _k1 = state
        return jnp.logical_and(t < t_end - 1e-6, n < MAX_NUM_STEPS)

    def body(state):
        t, h, n, y, k1 = state
        h_eff = jnp.minimum(h, t_end - t)

        # Stage sums grouped so the tableau constants are compile-time
        # immediates; only one runtime multiply by h_eff per stage / error.
        k2 = f(y + h_eff * (A21 * k1))
        k3 = f(y + h_eff * (A31 * k1 + A32 * k2))
        k4 = f(y + h_eff * (A41 * k1 + A42 * k2 + A43 * k3))
        k5 = f(y + h_eff * (A51 * k1 + A52 * k2 + A53 * k3 + A54 * k4))
        k6 = f(y + h_eff * (A61 * k1 + A62 * k2 + A63 * k3 + A64 * k4 + A65 * k5))
        y5 = y + h_eff * (B1 * k1 + B3 * k3 + B4 * k4 + B5 * k5 + B6 * k6)
        k7 = f(y5)  # FSAL: becomes k1 of the next accepted step

        err = h_eff * (E1 * k1 + E3 * k3 + E4 * k4 + E5 * k5 + E6 * k6 + E7 * k7)
        scale = ATOL + RTOL * jnp.maximum(jnp.abs(y), jnp.abs(y5))
        ratio = err * pl.reciprocal(scale, approx=True)
        if pad_mask is not None:
            ratio = ratio * pad_mask
        err_msq = jnp.sum(ratio * ratio) * inv_n_valid  # mean-square scaled error

        # accept iff RMS error <= 1; NaN/Inf compares False -> reject.
        accept = err_msq <= jnp.float32(1.0)

        # Step controller: h_new = h * clip(0.9 * rms_err^(-1/5), 0.2, 10),
        # computed on a (1,1) value (EUP exp/log; no full-vreg splat, no XLU
        # min reduce).  Non-finite error -> fall back to factor = 0.2 so the
        # controller never gets poisoned.
        # TODO(synk): torchdiffeq uses a PI controller + adaptive initial step;
        #             this is the plain order-5 controller with h0 = 0.05.
        err_c = jnp.full((1, 1), jnp.maximum(err_msq, jnp.float32(1e-20)),
                         dtype=jnp.float32)
        fac_c = jnp.clip(0.9 * jnp.exp(-0.1 * jnp.log(err_c)), 0.2, 10.0)
        finite = err_msq <= jnp.float32(3.0e38)  # False for Inf and NaN
        factor = jnp.where(finite, fac_c[0, 0], jnp.float32(0.2))
        h_n = h_eff * factor

        # Boolean selects: one vsel per carried vreg, and no 0*Inf NaN hazard
        # when a rejected oversized trial step overflowed y5 / k7.
        t_n = jnp.where(accept, t + h_eff, t)
        y_n = jnp.where(accept, y5, y)
        k1_n = jnp.where(accept, k7, k1)
        return (t_n, h_n, n + jnp.int32(1), y_n, k1_n)

    init = (jnp.float32(0.0), jnp.float32(0.05), jnp.int32(0), y0, k1_0)
    _t, _h, n_f, y_f, _k1 = lax.while_loop(cond, body, init)

    y_out_ref[...] = y_f
    nsteps_ref[0] = n_f  # surfaced so callers can detect hitting MAX_NUM_STEPS


_VMEM = pl.BlockSpec(memory_space=pltpu.MemorySpace.VMEM)
_SMEM = pl.BlockSpec(memory_space=pltpu.MemorySpace.SMEM)


def odeblock_forward(x, params):
    """ODEBlock.forward(x, eval_times=None): ODE solution at t=1."""
    x = x.astype(jnp.float32)
    w1, b1, w2, b2, w3, b3 = params
    B, D = x.shape
    H = w1.shape[1]

    Bp = max(8, -(-B // 8) * 8)                      # pad batch to full sublanes
    xp = x if Bp == B else jnp.pad(x, ((0, Bp - B), (0, 0)))

    # Advisory cost estimate: ~6 fused MLP evals per dopri5 step, ~32 steps.
    est_steps = 32
    flops_per_step = 6 * 2 * Bp * (D * H + H * H + H * D) + 60 * Bp * D
    cost = pl.CostEstimate(
        flops=flops_per_step * est_steps,
        transcendentals=(Bp * D + 2) * est_steps,
        bytes_accessed=4 * (w1.size + b1.size + w2.size + b2.size
                            + w3.size + b3.size + 2 * Bp * D),
    )

    kernel = functools.partial(_fused_dopri5_kernel, n_valid_rows=B)
    y_pad, _nsteps = pl.pallas_call(
        kernel,
        out_shape=(
            jax.ShapeDtypeStruct((Bp, D), jnp.float32),   # y(t=1), padded batch
            jax.ShapeDtypeStruct((1,), jnp.int32),        # solver steps taken
        ),
        in_specs=[_VMEM] * 7,
        out_specs=(_VMEM, _SMEM),
        input_output_aliases={0: 0},    # reuse the (padded) x buffer for y out
        cost_estimate=cost,
    )(xp, w1, b1, w2, b2, w3, b3)
    # TODO(synk): torchdiffeq raises if max_num_steps is exhausted; here the
    #             step count is surfaced via the second output but not checked.
    return y_pad[:B]


# ---- deterministic parameter init (matches nn.Linear default init bounds) ----
def init_odefunc_params(key, data_dim, hidden_dim):
    def linear(k, fan_in, fan_out):
        kw, kb = jax.random.split(k)
        bound = 1.0 / jnp.sqrt(jnp.float32(fan_in))
        w = jax.random.uniform(kw, (fan_in, fan_out), jnp.float32, -bound, bound)
        b = jax.random.uniform(kb, (1, fan_out), jnp.float32, -bound, bound)
        return w, b

    k1, k2, k3 = jax.random.split(key, 3)
    w1, b1 = linear(k1, data_dim, hidden_dim)
    w2, b2 = linear(k2, hidden_dim, hidden_dim)
    w3, b3 = linear(k3, hidden_dim, data_dim)
    return (w1, b1, w2, b2, w3, b3)


if __name__ == "__main__":
    B, DATA_DIM, HIDDEN_DIM = 8, 32, 32   # batch = 8 -> sublane-dense activations
    key = jax.random.PRNGKey(0)
    kx, kp = jax.random.split(key)
    x = jax.random.normal(kx, (B, DATA_DIM), dtype=jnp.float32)
    params = init_odefunc_params(kp, DATA_DIM, HIDDEN_DIM)

    out = jax.jit(odeblock_forward)(x, params)
    out = jax.block_until_ready(out)

    assert out.shape == (B, DATA_DIM)
    assert bool(jnp.all(jnp.isfinite(out)))
    print("KERNEL_OK")
</pallas_src>

<mosaic_0001>
module attributes {stable_mosaic.version = 11 : i64} {
  func.func @_fused_dopri5_kernel(%arg0: memref<8x32xf32, #tpu.memory_space<vmem>>, %arg1: memref<32x32xf32, #tpu.memory_space<vmem>>, %arg2: memref<1x32xf32, #tpu.memory_space<vmem>>, %arg3: memref<32x32xf32, #tpu.memory_space<vmem>>, %arg4: memref<1x32xf32, #tpu.memory_space<vmem>>, %arg5: memref<32x32xf32, #tpu.memory_space<vmem>>, %arg6: memref<1x32xf32, #tpu.memory_space<vmem>>, %arg7: memref<8x32xf32, #tpu.memory_space<vmem>>, %arg8: memref<1xi32, #tpu.memory_space<smem>>) attributes {dimension_semantics = [], scalar_prefetch = 0 : i64, scratch_operands = 0 : i64, tpu.core_type = #tpu.core_type<tc>} {
    %c0 = arith.constant 0 : index
    %c0_0 = arith.constant 0 : index
    %0 = vector.load %arg1[%c0, %c0_0] : memref<32x32xf32, #tpu.memory_space<vmem>>, vector<32x32xf32>
    %c0_1 = arith.constant 0 : index
    %c0_2 = arith.constant 0 : index
    %1 = vector.load %arg2[%c0_1, %c0_2] : memref<1x32xf32, #tpu.memory_space<vmem>>, vector<1x32xf32>
    %c0_3 = arith.constant 0 : index
    %c0_4 = arith.constant 0 : index
    %2 = vector.load %arg3[%c0_3, %c0_4] : memref<32x32xf32, #tpu.memory_space<vmem>>, vector<32x32xf32>
    %c0_5 = arith.constant 0 : index
    %c0_6 = arith.constant 0 : index
    %3 = vector.load %arg4[%c0_5, %c0_6] : memref<1x32xf32, #tpu.memory_space<vmem>>, vector<1x32xf32>
    %c0_7 = arith.constant 0 : index
    %c0_8 = arith.constant 0 : index
    %4 = vector.load %arg5[%c0_7, %c0_8] : memref<32x32xf32, #tpu.memory_space<vmem>>, vector<32x32xf32>
    %c0_9 = arith.constant 0 : index
    %c0_10 = arith.constant 0 : index
    %5 = vector.load %arg6[%c0_9, %c0_10] : memref<1x32xf32, #tpu.memory_space<vmem>>, vector<1x32xf32>
    %c0_11 = arith.constant 0 : index
    %c0_12 = arith.constant 0 : index
    %6 = vector.load %arg0[%c0_11, %c0_12] : memref<8x32xf32, #tpu.memory_space<vmem>>, vector<8x32xf32>
    %cst = arith.constant dense<0.000000e+00> : vector<8x32xf32>
    %7 = tpu.matmul %6, %0, %cst {dimension_numbers = #tpu.dot_dimension_numbers<[1], [0], [0], [1], [0, 0, 1, 1], [], []>} : vector<8x32xf32>, vector<32x32xf32>, vector<8x32xf32> -> vector<8x32xf32>
    %8 = vector.broadcast %1 : vector<1x32xf32> to vector<8x32xf32>
    %9 = arith.addf %7, %8 : vector<8x32xf32>
    %cst_13 = arith.constant 0.000000e+00 : f32
    %10 = vector.broadcast %cst_13 : f32 to vector<8x32xf32>
    %11 = arith.maximumf %9, %10 : vector<8x32xf32>
    %cst_14 = arith.constant dense<0.000000e+00> : vector<8x32xf32>
    %12 = tpu.matmul %11, %2, %cst_14 {dimension_numbers = #tpu.dot_dimension_numbers<[1], [0], [0], [1], [0, 0, 1, 1], [], []>} : vector<8x32xf32>, vector<32x32xf32>, vector<8x32xf32> -> vector<8x32xf32>
    %13 = vector.broadcast %3 : vector<1x32xf32> to vector<8x32xf32>
    %14 = arith.addf %12, %13 : vector<8x32xf32>
    %cst_15 = arith.constant 0.000000e+00 : f32
    %15 = vector.broadcast %cst_15 : f32 to vector<8x32xf32>
    %16 = arith.maximumf %14, %15 : vector<8x32xf32>
    %cst_16 = arith.constant dense<0.000000e+00> : vector<8x32xf32>
    %17 = tpu.matmul %16, %4, %cst_16 {dimension_numbers = #tpu.dot_dimension_numbers<[1], [0], [0], [1], [0, 0, 1, 1], [], []>} : vector<8x32xf32>, vector<32x32xf32>, vector<8x32xf32> -> vector<8x32xf32>
    %18 = vector.broadcast %5 : vector<1x32xf32> to vector<8x32xf32>
    %19 = arith.addf %17, %18 : vector<8x32xf32>
    %cst_17 = arith.constant 1.000000e+00 : f32
    %cst_18 = arith.constant 1.000000e+00 : f32
    %cst_19 = arith.constant 3.906250e-03 : f32
    %cst_20 = arith.constant 0.000000e+00 : f32
    %cst_21 = arith.constant 5.000000e-02 : f32
    %c0_i32 = arith.constant 0 : i32
    %20:5 = scf.while (%arg9 = %cst_20, %arg10 = %cst_21, %arg11 = %c0_i32, %arg12 = %6, %arg13 = %19) : (f32, f32, i32, vector<8x32xf32>, vector<8x32xf32>) -> (f32, f32, i32, vector<8x32xf32>, vector<8x32xf32>) {
      %cst_25 = arith.constant 9.99999997E-7 : f32
      %23 = arith.subf %cst_17, %cst_25 : f32
      %24 = arith.cmpf olt, %arg9, %23 : f32
      %c1000_i32 = arith.constant 1000 : i32
      %25 = arith.cmpi slt, %arg11, %c1000_i32 : i32
      %26 = arith.andi %24, %25 : i1
      scf.condition(%26) %arg9, %arg10, %arg11, %arg12, %arg13 : f32, f32, i32, vector<8x32xf32>, vector<8x32xf32>
    } do {
    ^bb0(%arg9: f32, %arg10: f32, %arg11: i32, %arg12: vector<8x32xf32>, %arg13: vector<8x32xf32>):
      %23 = arith.subf %cst_18, %arg9 : f32
      %24 = arith.minimumf %arg10, %23 : f32
      %cst_25 = arith.constant 2.000000e-01 : f32
      %25 = vector.broadcast %cst_25 : f32 to vector<8x32xf32>
      %26 = arith.mulf %25, %arg13 : vector<8x32xf32>
      %27 = vector.broadcast %24 : f32 to vector<8x32xf32>
      %28 = arith.mulf %27, %26 : vector<8x32xf32>
      %29 = arith.addf %arg12, %28 : vector<8x32xf32>
      %cst_26 = arith.constant dense<0.000000e+00> : vector<8x32xf32>
      %30 = tpu.matmul %29, %0, %cst_26 {dimension_numbers = #tpu.dot_dimension_numbers<[1], [0], [0], [1], [0, 0, 1, 1], [], []>} : vector<8x32xf32>, vector<32x32xf32>, vector<8x32xf32> -> vector<8x32xf32>
      %31 = vector.broadcast %1 : vector<1x32xf32> to vector<8x32xf32>
      %32 = arith.addf %30, %31 : vector<8x32xf32>
      %cst_27 = arith.constant 0.000000e+00 : f32
      %33 = vector.broadcast %cst_27 : f32 to vector<8x32xf32>
      %34 = arith.maximumf %32, %33 : vector<8x32xf32>
      %cst_28 = arith.constant dense<0.000000e+00> : vector<8x32xf32>
      %35 = tpu.matmul %34, %2, %cst_28 {dimension_numbers = #tpu.dot_dimension_numbers<[1], [0], [0], [1], [0, 0, 1, 1], [], []>} : vector<8x32xf32>, vector<32x32xf32>, vector<8x32xf32> -> vector<8x32xf32>
      %36 = vector.broadcast %3 : vector<1x32xf32> to vector<8x32xf32>
      %37 = arith.addf %35, %36 : vector<8x32xf32>
      %cst_29 = arith.constant 0.000000e+00 : f32
      %38 = vector.broadcast %cst_29 : f32 to vector<8x32xf32>
      %39 = arith.maximumf %37, %38 : vector<8x32xf32>
      %cst_30 = arith.constant dense<0.000000e+00> : vector<8x32xf32>
      %40 = tpu.matmul %39, %4, %cst_30 {dimension_numbers = #tpu.dot_dimension_numbers<[1], [0], [0], [1], [0, 0, 1, 1], [], []>} : vector<8x32xf32>, vector<32x32xf32>, vector<8x32xf32> -> vector<8x32xf32>
      %41 = vector.broadcast %5 : vector<1x32xf32> to vector<8x32xf32>
      %42 = arith.addf %40, %41 : vector<8x32xf32>
      %cst_31 = arith.constant 7.500000e-02 : f32
      %43 = vector.broadcast %cst_31 : f32 to vector<8x32xf32>
      %44 = arith.mulf %43, %arg13 : vector<8x32xf32>
      %cst_32 = arith.constant 2.250000e-01 : f32
      %45 = vector.broadcast %cst_32 : f32 to vector<8x32xf32>
      %46 = arith.mulf %45, %42 : vector<8x32xf32>
      %47 = arith.addf %44, %46 : vector<8x32xf32>
      %48 = vector.broadcast %24 : f32 to vector<8x32xf32>
      %49 = arith.mulf %48, %47 : vector<8x32xf32>
      %50 = arith.addf %arg12, %49 : vector<8x32xf32>
      %cst_33 = arith.constant dense<0.000000e+00> : vector<8x32xf32>
      %51 = tpu.matmul %50, %0, %cst_33 {dimension_numbers = #tpu.dot_dimension_numbers<[1], [0], [0], [1], [0, 0, 1, 1], [], []>} : vector<8x32xf32>, vector<32x32xf32>, vector<8x32xf32> -> vector<8x32xf32>
      %52 = vector.broadcast %1 : vector<1x32xf32> to vector<8x32xf32>
      %53 = arith.addf %51, %52 : vector<8x32xf32>
      %cst_34 = arith.constant 0.000000e+00 : f32
      %54 = vector.broadcast %cst_34 : f32 to vector<8x32xf32>
      %55 = arith.maximumf %53, %54 : vector<8x32xf32>
      %cst_35 = arith.constant dense<0.000000e+00> : vector<8x32xf32>
      %56 = tpu.matmul %55, %2, %cst_35 {dimension_numbers = #tpu.dot_dimension_numbers<[1], [0], [0], [1], [0, 0, 1, 1], [], []>} : vector<8x32xf32>, vector<32x32xf32>, vector<8x32xf32> -> vector<8x32xf32>
      %57 = vector.broadcast %3 : vector<1x32xf32> to vector<8x32xf32>
      %58 = arith.addf %56, %57 : vector<8x32xf32>
      %cst_36 = arith.constant 0.000000e+00 : f32
      %59 = vector.broadcast %cst_36 : f32 to vector<8x32xf32>
      %60 = arith.maximumf %58, %59 : vector<8x32xf32>
      %cst_37 = arith.constant dense<0.000000e+00> : vector<8x32xf32>
      %61 = tpu.matmul %60, %4, %cst_37 {dimension_numbers = #tpu.dot_dimension_numbers<[1], [0], [0], [1], [0, 0, 1, 1], [], []>} : vector<8x32xf32>, vector<32x32xf32>, vector<8x32xf32> -> vector<8x32xf32>
      %62 = vector.broadcast %5 : vector<1x32xf32> to vector<8x32xf32>
      %63 = arith.addf %61, %62 : vector<8x32xf32>
      %cst_38 = arith.constant 0.977777779 : f32
      %64 = vector.broadcast %cst_38 : f32 to vector<8x32xf32>
      %65 = arith.mulf %64, %arg13 : vector<8x32xf32>
      %cst_39 = arith.constant -3.73333335 : f32
      %66 = vector.broadcast %cst_39 : f32 to vector<8x32xf32>
      %67 = arith.mulf %66, %42 : vector<8x32xf32>
      %68 = arith.addf %65, %67 : vector<8x32xf32>
      %cst_40 = arith.constant 3.55555558 : f32
      %69 = vector.broadcast %cst_40 : f32 to vector<8x32xf32>
      %70 = arith.mulf %69, %63 : vector<8x32xf32>
      %71 = arith.addf %68, %70 : vector<8x32xf32>
      %72 = vector.broadcast %24 : f32 to vector<8x32xf32>
      %73 = arith.mulf %72, %71 : vector<8x32xf32>
      %74 = arith.addf %arg12, %73 : vector<8x32xf32>
      %cst_41 = arith.constant dense<0.000000e+00> : vector<8x32xf32>
      %75 = tpu.matmul %74, %0, %cst_41 {dimension_numbers = #tpu.dot_dimension_numbers<[1], [0], [0], [1], [0, 0, 1, 1], [], []>} : vector<8x32xf32>, vector<32x32xf32>, vector<8x32xf32> -> vector<8x32xf32>
      %76 = vector.broadcast %1 : vector<1x32xf32> to vector<8x32xf32>
      %77 = arith.addf %75, %76 : vector<8x32xf32>
      %cst_42 = arith.constant 0.000000e+00 : f32
      %78 = vector.broadcast %cst_42 : f32 to vector<8x32xf32>
      %79 = arith.maximumf %77, %78 : vector<8x32xf32>
      %cst_43 = arith.constant dense<0.000000e+00> : vector<8x32xf32>
      %80 = tpu.matmul %79, %2, %cst_43 {dimension_numbers = #tpu.dot_dimension_numbers<[1], [0], [0], [1], [0, 0, 1, 1], [], []>} : vector<8x32xf32>, vector<32x32xf32>, vector<8x32xf32> -> vector<8x32xf32>
      %81 = vector.broadcast %3 : vector<1x32xf32> to vector<8x32xf32>
      %82 = arith.addf %80, %81 : vector<8x32xf32>
      %cst_44 = arith.constant 0.000000e+00 : f32
      %83 = vector.broadcast %cst_44 : f32 to vector<8x32xf32>
      %84 = arith.maximumf %82, %83 : vector<8x32xf32>
      %cst_45 = arith.constant dense<0.000000e+00> : vector<8x32xf32>
      %85 = tpu.matmul %84, %4, %cst_45 {dimension_numbers = #tpu.dot_dimension_numbers<[1], [0], [0], [1], [0, 0, 1, 1], [], []>} : vector<8x32xf32>, vector<32x32xf32>, vector<8x32xf32> -> vector<8x32xf32>
      %86 = vector.broadcast %5 : vector<1x32xf32> to vector<8x32xf32>
      %87 = arith.addf %85, %86 : vector<8x32xf32>
      %cst_46 = arith.constant 2.95259857 : f32
      %88 = vector.broadcast %cst_46 : f32 to vector<8x32xf32>
      %89 = arith.mulf %88, %arg13 : vector<8x32xf32>
      %cst_47 = arith.constant -11.5957937 : f32
      %90 = vector.broadcast %cst_47 : f32 to vector<8x32xf32>
      %91 = arith.mulf %90, %42 : vector<8x32xf32>
      %92 = arith.addf %89, %91 : vector<8x32xf32>
      %cst_48 = arith.constant 9.82289314 : f32
      %93 = vector.broadcast %cst_48 : f32 to vector<8x32xf32>
      %94 = arith.mulf %93, %63 : vector<8x32xf32>
      %95 = arith.addf %92, %94 : vector<8x32xf32>
      %cst_49 = arith.constant -0.290809333 : f32
      %96 = vector.broadcast %cst_49 : f32 to vector<8x32xf32>
      %97 = arith.mulf %96, %87 : vector<8x32xf32>
      %98 = arith.addf %95, %97 : vector<8x32xf32>
      %99 = vector.broadcast %24 : f32 to vector<8x32xf32>
      %100 = arith.mulf %99, %98 : vector<8x32xf32>
      %101 = arith.addf %arg12, %100 : vector<8x32xf32>
      %cst_50 = arith.constant dense<0.000000e+00> : vector<8x32xf32>
      %102 = tpu.matmul %101, %0, %cst_50 {dimension_numbers = #tpu.dot_dimension_numbers<[1], [0], [0], [1], [0, 0, 1, 1], [], []>} : vector<8x32xf32>, vector<32x32xf32>, vector<8x32xf32> -> vector<8x32xf32>
      %103 = vector.broadcast %1 : vector<1x32xf32> to vector<8x32xf32>
      %104 = arith.addf %102, %103 : vector<8x32xf32>
      %cst_51 = arith.constant 0.000000e+00 : f32
      %105 = vector.broadcast %cst_51 : f32 to vector<8x32xf32>
      %106 = arith.maximumf %104, %105 : vector<8x32xf32>
      %cst_52 = arith.constant dense<0.000000e+00> : vector<8x32xf32>
      %107 = tpu.matmul %106, %2, %cst_52 {dimension_numbers = #tpu.dot_dimension_numbers<[1], [0], [0], [1], [0, 0, 1, 1], [], []>} : vector<8x32xf32>, vector<32x32xf32>, vector<8x32xf32> -> vector<8x32xf32>
      %108 = vector.broadcast %3 : vector<1x32xf32> to vector<8x32xf32>
      %109 = arith.addf %107, %108 : vector<8x32xf32>
      %cst_53 = arith.constant 0.000000e+00 : f32
      %110 = vector.broadcast %cst_53 : f32 to vector<8x32xf32>
      %111 = arith.maximumf %109, %110 : vector<8x32xf32>
      %cst_54 = arith.constant dense<0.000000e+00> : vector<8x32xf32>
      %112 = tpu.matmul %111, %4, %cst_54 {dimension_numbers = #tpu.dot_dimension_numbers<[1], [0], [0], [1], [0, 0, 1, 1], [], []>} : vector<8x32xf32>, vector<32x32xf32>, vector<8x32xf32> -> vector<8x32xf32>
      %113 = vector.broadcast %5 : vector<1x32xf32> to vector<8x32xf32>
      %114 = arith.addf %112, %113 : vector<8x32xf32>
      %cst_55 = arith.constant 2.84627533 : f32
      %115 = vector.broadcast %cst_55 : f32 to vector<8x32xf32>
      %116 = arith.mulf %115, %arg13 : vector<8x32xf32>
      %cst_56 = arith.constant -10.757576 : f32
      %117 = vector.broadcast %cst_56 : f32 to vector<8x32xf32>
      %118 = arith.mulf %117, %42 : vector<8x32xf32>
      %119 = arith.addf %116, %118 : vector<8x32xf32>
      %cst_57 = arith.constant 8.90642261 : f32
      %120 = vector.broadcast %cst_57 : f32 to vector<8x32xf32>
      %121 = arith.mulf %120, %63 : vector<8x32xf32>
      %122 = arith.addf %119, %121 : vector<8x32xf32>
      %cst_58 = arith.constant 0.278409094 : f32
      %123 = vector.broadcast %cst_58 : f32 to vector<8x32xf32>
      %124 = arith.mulf %123, %87 : vector<8x32xf32>
      %125 = arith.addf %122, %124 : vector<8x32xf32>
      %cst_59 = arith.constant -0.273531318 : f32
      %126 = vector.broadcast %cst_59 : f32 to vector<8x32xf32>
      %127 = arith.mulf %126, %114 : vector<8x32xf32>
      %128 = arith.addf %125, %127 : vector<8x32xf32>
      %129 = vector.broadcast %24 : f32 to vector<8x32xf32>
      %130 = arith.mulf %129, %128 : vector<8x32xf32>
      %131 = arith.addf %arg12, %130 : vector<8x32xf32>
      %cst_60 = arith.constant dense<0.000000e+00> : vector<8x32xf32>
      %132 = tpu.matmul %131, %0, %cst_60 {dimension_numbers = #tpu.dot_dimension_numbers<[1], [0], [0], [1], [0, 0, 1, 1], [], []>} : vector<8x32xf32>, vector<32x32xf32>, vector<8x32xf32> -> vector<8x32xf32>
      %133 = vector.broadcast %1 : vector<1x32xf32> to vector<8x32xf32>
      %134 = arith.addf %132, %133 : vector<8x32xf32>
      %cst_61 = arith.constant 0.000000e+00 : f32
      %135 = vector.broadcast %cst_61 : f32 to vector<8x32xf32>
      %136 = arith.maximumf %134, %135 : vector<8x32xf32>
      %cst_62 = arith.constant dense<0.000000e+00> : vector<8x32xf32>
      %137 = tpu.matmul %136, %2, %cst_62 {dimension_numbers = #tpu.dot_dimension_numbers<[1], [0], [0], [1], [0, 0, 1, 1], [], []>} : vector<8x32xf32>, vector<32x32xf32>, vector<8x32xf32> -> vector<8x32xf32>
      %138 = vector.broadcast %3 : vector<1x32xf32> to vector<8x32xf32>
      %139 = arith.addf %137, %138 : vector<8x32xf32>
      %cst_63 = arith.constant 0.000000e+00 : f32
      %140 = vector.broadcast %cst_63 : f32 to vector<8x32xf32>
      %141 = arith.maximumf %139, %140 : vector<8x32xf32>
      %cst_64 = arith.constant dense<0.000000e+00> : vector<8x32xf32>
      %142 = tpu.matmul %141, %4, %cst_64 {dimension_numbers = #tpu.dot_dimension_numbers<[1], [0], [0], [1], [0, 0, 1, 1], [], []>} : vector<8x32xf32>, vector<32x32xf32>, vector<8x32xf32> -> vector<8x32xf32>
      %143 = vector.broadcast %5 : vector<1x32xf32> to vector<8x32xf32>
      %144 = arith.addf %142, %143 : vector<8x32xf32>
      %cst_65 = arith.constant 0.0911458358 : f32
      %145 = vector.broadcast %cst_65 : f32 to vector<8x32xf32>
      %146 = arith.mulf %145, %arg13 : vector<8x32xf32>
      %cst_66 = arith.constant 0.449236304 : f32
      %147 = vector.broadcast %cst_66 : f32 to vector<8x32xf32>
      %148 = arith.mulf %147, %63 : vector<8x32xf32>
      %149 = arith.addf %146, %148 : vector<8x32xf32>
      %cst_67 = arith.constant 0.651041686 : f32
      %150 = vector.broadcast %cst_67 : f32 to vector<8x32xf32>
      %151 = arith.mulf %150, %87 : vector<8x32xf32>
      %152 = arith.addf %149, %151 : vector<8x32xf32>
      %cst_68 = arith.constant -0.322376192 : f32
      %153 = vector.broadcast %cst_68 : f32 to vector<8x32xf32>
      %154 = arith.mulf %153, %114 : vector<8x32xf32>
      %155 = arith.addf %152, %154 : vector<8x32xf32>
      %cst_69 = arith.constant 0.130952388 : f32
      %156 = vector.broadcast %cst_69 : f32 to vector<8x32xf32>
      %157 = arith.mulf %156, %144 : vector<8x32xf32>
      %158 = arith.addf %155, %157 : vector<8x32xf32>
      %159 = vector.broadcast %24 : f32 to vector<8x32xf32>
      %160 = arith.mulf %159, %158 : vector<8x32xf32>
      %161 = arith.addf %arg12, %160 : vector<8x32xf32>
      %cst_70 = arith.constant dense<0.000000e+00> : vector<8x32xf32>
      %162 = tpu.matmul %161, %0, %cst_70 {dimension_numbers = #tpu.dot_dimension_numbers<[1], [0], [0], [1], [0, 0, 1, 1], [], []>} : vector<8x32xf32>, vector<32x32xf32>, vector<8x32xf32> -> vector<8x32xf32>
      %163 = vector.broadcast %1 : vector<1x32xf32> to vector<8x32xf32>
      %164 = arith.addf %162, %163 : vector<8x32xf32>
      %cst_71 = arith.constant 0.000000e+00 : f32
      %165 = vector.broadcast %cst_71 : f32 to vector<8x32xf32>
      %166 = arith.maximumf %164, %165 : vector<8x32xf32>
      %cst_72 = arith.constant dense<0.000000e+00> : vector<8x32xf32>
      %167 = tpu.matmul %166, %2, %cst_72 {dimension_numbers = #tpu.dot_dimension_numbers<[1], [0], [0], [1], [0, 0, 1, 1], [], []>} : vector<8x32xf32>, vector<32x32xf32>, vector<8x32xf32> -> vector<8x32xf32>
      %168 = vector.broadcast %3 : vector<1x32xf32> to vector<8x32xf32>
      %169 = arith.addf %167, %168 : vector<8x32xf32>
      %cst_73 = arith.constant 0.000000e+00 : f32
      %170 = vector.broadcast %cst_73 : f32 to vector<8x32xf32>
      %171 = arith.maximumf %169, %170 : vector<8x32xf32>
      %cst_74 = arith.constant dense<0.000000e+00> : vector<8x32xf32>
      %172 = tpu.matmul %171, %4, %cst_74 {dimension_numbers = #tpu.dot_dimension_numbers<[1], [0], [0], [1], [0, 0, 1, 1], [], []>} : vector<8x32xf32>, vector<32x32xf32>, vector<8x32xf32> -> vector<8x32xf32>
      %173 = vector.broadcast %5 : vector<1x32xf32> to vector<8x32xf32>
      %174 = arith.addf %172, %173 : vector<8x32xf32>
      %cst_75 = arith.constant 0.00123263884 : f32
      %175 = vector.broadcast %cst_75 : f32 to vector<8x32xf32>
      %176 = arith.mulf %175, %arg13 : vector<8x32xf32>
      %cst_76 = arith.constant -0.00425277045 : f32
      %177 = vector.broadcast %cst_76 : f32 to vector<8x32xf32>
      %178 = arith.mulf %177, %63 : vector<8x32xf32>
      %179 = arith.addf %176, %178 : vector<8x32xf32>
      %cst_77 = arith.constant 0.0369791649 : f32
      %180 = vector.broadcast %cst_77 : f32 to vector<8x32xf32>
      %181 = arith.mulf %180, %87 : vector<8x32xf32>
      %182 = arith.addf %179, %181 : vector<8x32xf32>
      %cst_78 = arith.constant -5.086380e-02 : f32
      %183 = vector.broadcast %cst_78 : f32 to vector<8x32xf32>
      %184 = arith.mulf %183, %114 : vector<8x32xf32>
      %185 = arith.addf %182, %184 : vector<8x32xf32>
      %cst_79 = arith.constant 0.0419047624 : f32
      %186 = vector.broadcast %cst_79 : f32 to vector<8x32xf32>
      %187 = arith.mulf %186, %144 : vector<8x32xf32>
      %188 = arith.addf %185, %187 : vector<8x32xf32>
      %cst_80 = arith.constant -2.500000e-02 : f32
      %189 = vector.broadcast %cst_80 : f32 to vector<8x32xf32>
      %190 = arith.mulf %189, %174 : vector<8x32xf32>
      %191 = arith.addf %188, %190 : vector<8x32xf32>
      %192 = vector.broadcast %24 : f32 to vector<8x32xf32>
      %193 = arith.mulf %192, %191 : vector<8x32xf32>
      %194 = math.absf %arg12 : vector<8x32xf32>
      %195 = math.absf %161 : vector<8x32xf32>
      %196 = arith.maximumf %194, %195 : vector<8x32xf32>
      %cst_81 = arith.constant 1.000000e-03 : f32
      %197 = vector.broadcast %cst_81 : f32 to vector<8x32xf32>
      %198 = arith.mulf %197, %196 : vector<8x32xf32>
      %cst_82 = arith.constant 1.000000e-03 : f32
      %199 = vector.broadcast %cst_82 : f32 to vector<8x32xf32>
      %200 = arith.addf %199, %198 : vector<8x32xf32>
      %201 = tpu.reciprocal %200 {approx = true} : vector<8x32xf32> -> vector<8x32xf32>
      %202 = arith.mulf %193, %201 : vector<8x32xf32>
      %203 = arith.mulf %202, %202 : vector<8x32xf32>
      %204 = vector.shape_cast %203 : vector<8x32xf32> to vector<1x8x32xf32>
      %cst_83 = arith.constant dense<0.000000e+00> : vector<1xf32>
      %205 = vector.multi_reduction <add>, %204, %cst_83 [1, 2] : vector<1x8x32xf32> to vector<1xf32>
      %206 = vector.shape_cast %205 : vector<1xf32> to vector<1x1x1xf32>
      %207 = vector.extract %206[0, 0, 0] : f32 from vector<1x1x1xf32>
      %208 = arith.mulf %207, %cst_19 : f32
      %cst_84 = arith.constant 1.000000e+00 : f32
      %209 = arith.cmpf ole, %208, %cst_84 : f32
      %cst_85 = arith.constant 9.99999968E-21 : f32
      %210 = arith.maximumf %208, %cst_85 : f32
      %211 = vector.broadcast %210 : f32 to vector<1x1xf32>
      %212 = math.log %211 : vector<1x1xf32>
      %cst_86 = arith.constant -1.000000e-01 : f32
      %213 = vector.broadcast %cst_86 : f32 to vector<1x1xf32>
      %214 = arith.mulf %213, %212 : vector<1x1xf32>
      %215 = math.exp %214 : vector<1x1xf32>
      %cst_87 = arith.constant 0.899999976 : f32
      %216 = vector.broadcast %cst_87 : f32 to vector<1x1xf32>
      %217 = arith.mulf %216, %215 : vector<1x1xf32>
      %cst_88 = arith.constant 2.000000e-01 : f32
      %cst_89 = arith.constant 1.000000e+01 : f32
      %218 = vector.broadcast %cst_88 : f32 to vector<1x1xf32>
      %219 = arith.maximumf %218, %217 : vector<1x1xf32>
      %220 = vector.broadcast %cst_89 : f32 to vector<1x1xf32>
      %221 = arith.minimumf %220, %219 : vector<1x1xf32>
      %cst_90 = arith.constant 3.000000e+38 : f32
      %222 = arith.cmpf ole, %208, %cst_90 : f32
      %223 = vector.extract %221[0, 0] : f32 from vector<1x1xf32>
      %cst_91 = arith.constant 2.000000e-01 : f32
      %224 = arith.select %222, %223, %cst_91 : f32
      %225 = arith.mulf %24, %224 : f32
      %226 = arith.addf %arg9, %24 : f32
      %227 = arith.select %209, %226, %arg9 : f32
      %228 = arith.select %209, %161, %arg12 : vector<8x32xf32>
      %229 = arith.select %209, %174, %arg13 : vector<8x32xf32>
      %c1_i32 = arith.constant 1 : i32
      %230 = arith.addi %arg11, %c1_i32 : i32
      scf.yield %227, %225, %230, %228, %229 : f32, f32, i32, vector<8x32xf32>, vector<8x32xf32>
    }
    %c0_22 = arith.constant 0 : index
    %c0_23 = arith.constant 0 : index
    %21 = vector.load %arg7[%c0_22, %c0_23] : memref<8x32xf32, #tpu.memory_space<vmem>>, vector<8x32xf32>
    tpu.vector_store %arg7[%c0_22, %c0_23], %20#3 {strides = array<i32>} : memref<8x32xf32, #tpu.memory_space<vmem>>, vector<8x32xf32>,
    %c0_24 = arith.constant 0 : index
    %22 = memref.load %arg8[%c0_24] : memref<1xi32, #tpu.memory_space<smem>>
    memref.store %20#2, %arg8[%c0_24] : memref<1xi32, #tpu.memory_space<smem>>
    return
  }
}

</mosaic_0001>

<bundles_post_ra>
// kernel: odeblock_forward.1
= control target key start
LH: loop header
LB: loop body
LE: loop exit
PB: predicated region body
PF: predicated region fallthrough
CT: control target
= control target key end

     0   :  { %14 = vsyncpa [#allocation3], 0  ;;  %s2822_s0 = inlined_call_operand.vmem [shape: f32[8,32], index: 0, kind: input, shape index: {}, may-alias: {0,7}]   ;;  %s2823_s1 = inlined_call_operand.hbm [shape: f32[32,32], index: 1, kind: input, shape index: {}]   ;;  %s2824_s2 = inlined_call_operand.vmem [shape: f32[1,32], index: 2, kind: input, shape index: {}]   ;;  %s2825_s3 = inlined_call_operand.hbm [shape: f32[32,32], index: 3, kind: input, shape index: {}]   ;;  %s2826_s4 = inlined_call_operand.vmem [shape: f32[1,32], index: 4, kind: input, shape index: {}]   ;;  %s2827_s5 = inlined_call_operand.vmem [shape: f32[32,32], index: 5, kind: input, shape index: {}]   ;;  %s2828_s6 = inlined_call_operand.vmem [shape: f32[1,32], index: 6, kind: input, shape index: {}]   ;;  %s2829_s7 = inlined_call_operand.vmem [shape: f32[8,32], index: 7, kind: output, shape index: {0}, may-alias: {0,7}]   ;;  %s2830_s8 = inlined_call_operand.hbm [shape: s32[1], index: 8, kind: output, shape index: {1}]  }
   0x1   :  { %15 = vsyncpa [#allocation6], 0 }
   0x2   :  { %16 = vsyncpa [#allocation4], 0  ;;  %s2443_s27 = smov [#allocation2]   ;;  %s2343_s9 = scalar_lea.hbm %s2823_s1, 512 }
   0x3   :  { %s24_s28 = sshll.u32 %s2443_s27, 4  ;;  %p2344_p0 = scmp.ne.s32.totalorder %s2823_s1, %s2343_s9  ;;  %s25_s28 = int_to_ptr.vmem [resolvable:$true] %s24_s28 }
   0x4   :  { %p2347_p1 = scmp.lt.u32.totalorder %s2343_s9, %s2823_s1 }
   0x6   :  { %p2349_p2 = pnand %p2347_p1, %p2344_p0 }
   0x8   :  { %2352 = shalt.err (!%p2349_p2)
}
   0x9   :  { %s2353_s14 = scalar_lea.vmem %s25_s28, 512  ;;  %p2358_p4 = scmp.lt.s32.totalorder %s25_s28, %s25_s28 }
   0xa   :  { %p2354_p3 = scmp.ne.s32.totalorder %s25_s28, %s2353_s14  ;;  %p2359_p5 = scmp.lt.s32.totalorder %s2353_s14, %s2353_s14 }
   0xc   :  { %p2360_p6 = por %p2359_p5, %p2358_p4 }
   0xe   :  { %p2361_p7 = pnand %p2360_p6, %p2354_p3 }
  0x10   :  { %2364 = shalt.err (!%p2361_p7)
}
  0x11   :  { %s2444_s15 = smov 128   ;;  %s2445_s16 = smov 8  }
  0x12   :  { %30 = dma.hbm_to_vmem [thread:$0]  %s2823_s1, 512, %s25_s28, [#allocation3], %s2444_s15, %s2444_s15, %s2445_s16  }
  0x13   :  { %s2446_s19 = smov [#allocation5]   ;;  %s2365_s23 = scalar_lea.hbm %s2825_s3, 512 }
  0x14   :  { %s38_s20 = sshll.u32 %s2446_s19, 4  ;;  %p2366_p8 = scmp.ne.s32.totalorder %s2825_s3, %s2365_s23  ;;  %s39_s20 = int_to_ptr.vmem [resolvable:$true] %s38_s20 }
  0x15   :  { %p2369_p9 = scmp.lt.u32.totalorder %s2365_s23, %s2825_s3 }
  0x17   :  { %p2371_p10 = pnand %p2369_p9, %p2366_p8 }
  0x19   :  { %2374 = shalt.err (!%p2371_p10)
}
  0x1a   :  { %s2375_s29 = scalar_lea.vmem %s39_s20, 512  ;;  %p2380_p12 = scmp.lt.s32.totalorder %s39_s20, %s39_s20 }
  0x1b   :  { %p2376_p11 = scmp.ne.s32.totalorder %s39_s20, %s2375_s29  ;;  %p2381_p13 = scmp.lt.s32.totalorder %s2375_s29, %s2375_s29 }
  0x1d   :  { %p2382_p0 = por %p2381_p13, %p2380_p12 }
  0x1f   :  { %p2383_p1 = pnand %p2382_p0, %p2376_p11 }
  0x21   :  { %2386 = shalt.err (!%p2383_p1)
}
  0x22   :  { %44 = dma.hbm_to_vmem [thread:$0]  %s2825_s3, 512, %s39_s20, [#allocation6], %s2444_s15, %s2444_s15, %s2445_s16  }
  0x23   :  { %2417 = dma.done.wait [#allocation3], 512  }
  0x24   :  { %2418 = vsyncadd [#allocation3], 4294966784 }
  0x25   :  { %2419 = dma.done.wait [#allocation6], 512  }
  0x26   :  { %2420 = vsyncadd [#allocation6], 4294966784  ;;  %v2447_v0 = vmov 0.0|0.0   ;;  %vm2448_vm0 = vmmov 0   ;;  %v2449_v1 = vmov 0.0   ;;  %v57_v2 = vld [vmem:[#allocation2] sm:$0xff] }
  0x27   :  { %2155 = vmatprep.subr.bf16.mxu0 %v2447_v0  ;;  %1932 = vmatprep.mubr.msk.f32.mxu0 %vm2448_vm0, %v2449_v1  ;;  %v58_v3 = vld [vmem:[#allocation2 + $0x8] sm:$0xff]  ;;  %v59_v4 = vld [vmem:[#allocation2 + $0x10] sm:$0xff]  ;;  %v60_v6 = vld [vmem:[#allocation2 + $0x18] sm:$0xff]  ;;  %vm79_vm1 = vcmask 261120   ;;  %s2589_s21 = smov 0.0  }
  0x28   :  { %2161 = vmatprep.subr.bf16.mxu1 %v2447_v0  ;;  %1943 = vmatprep.mubr.msk.f32.mxu1 %vm2448_vm0, %v2449_v1  ;;  %v2526_v5 = vpack.c.bf16 %v58_v3, %v57_v2  ;;  %v62_v7 = vld [vmem:[#allocation5] sm:$0xff]  ;;  %v63_v8 = vld [vmem:[#allocation5 + $0x8] sm:$0xff]  ;;  %v2529_v9 = vpack.c.bf16 %v60_v6, %v59_v4  ;;  %v72_v11 = vld [vmem:[%s2822_s0] sm:$0xff]  }
  0x29   :  { %v2531_v10 = vpack.c.bf16 %v63_v8, %v62_v7  ;;  %v64_v12 = vld [vmem:[#allocation5 + $0x10] sm:$0xff]  ;;  %v65_v13 = vld [vmem:[#allocation5 + $0x18] sm:$0xff]  ;;  %v68_v16 = vld [vmem:[%s2827_s5 + $0x8] sm:$0xff] }
  0x2a   :  { %2157 = vmatpush3.bf16.msra.mxu0 %v2526_v5  ;;  %v2540_v14 = vpack.c.bf16 %v65_v13, %v64_v12  ;;  %v67_v15 = vld [vmem:[%s2827_s5] sm:$0xff]  ;;  %v69_v23 = vld [vmem:[%s2827_s5 + $0x10] sm:$0xff]  ;;  %v70_v24 = vld [vmem:[%s2827_s5 + $0x18] sm:$0xff]  ;;  %s2587_s5 = smov 0.05  }
  0x2b   :  { %2158 = vmatprep.subr.bf16.mxu0 %v2447_v0  ;;  %2163 = vmatpush3.bf16.msra.mxu1 %v2531_v10  ;;  %v2549_v17 = vpack.c.bf16 %v68_v16, %v67_v15  ;;  %v2555_v18 = vld [vmem:[%s2824_s2] ss:$0 sm:$0xff]  ;;  %v2565_v25 = vpack.c.bf16 %v70_v24, %v69_v23 }
  0x2c   :  { %2164 = vmatprep.subr.bf16.mxu1 %v2447_v0  ;;  %v2571_v26 = vld [vmem:[%s2826_s4] ss:$0 sm:$0xff]  ;;  %s2585_s4 = smov 0  }
  0x2d   :  { %v2578_v31 = vld [vmem:[%s2828_s6] ss:$0 sm:$0xff] }
  0x2e   :  { %2160 = vmatpush3.bf16.msra.mxu0 %v2529_v9 }
  0x2f   :  { %2167 = vmatprep.subr.bf16.mxu0 %v2447_v0  ;;  %2166 = vmatpush3.bf16.msra.mxu1 %v2540_v14 }
  0x31   :  { %1933 = vmatmul.mubr.msk.f32.vlgmr.msra.gmra.mrb[0].mxu0 %vm79_vm1, %v72_v11 }
  0x32   :  { %1954 = vmatprep.mubr.msk.f32.mxu0 %vm2448_vm0, %v2449_v1  ;;  %2169 = vmatpush3.bf16.msra.mxu0 %v2549_v17 }
  0x33   :  { %2170 = vmatprep.subr.bf16.mxu0 %v2447_v0 }
  0x36   :  { %2172 = vmatpush3.bf16.msra.mxu0 %v2565_v25 }
 0x104   :  { %v149_v19 = vpop.f32.mrb[0].mxu0 }
 0x105   :  { %v150_v20 = vadd.f32 %v2555_v18, %v149_v19  ;;  %v1934_v21 = vpop.f32.mrb[1].mxu0 }
 0x107   :  { %v153_v22 = vmax.f32 %v150_v20, 0.0 }
 0x109   :  { %1944 = vmatmul.mubr.msk.f32.vlgmr.msra.gmra.mrb[0].mxu1 %vm79_vm1, %v153_v22 }
 0x1dc   :  { %v229_v27 = vpop.f32.mrb[0].mxu1 }
 0x1dd   :  { %v230_v28 = vadd.f32 %v2571_v26, %v229_v27  ;;  %v1945_v29 = vpop.f32.mrb[1].mxu1 }
 0x1df   :  { %v233_v30 = vmax.f32 %v230_v28, 0.0 }
 0x1e1   :  { %1955 = vmatmul.mubr.msk.f32.vlgmr.msra.gmra.mrb[2].mxu0 %vm79_vm1, %v233_v30 }
 0x2b4   :  { %v309_v32 = vpop.f32.mrb[2].mxu0 }
 0x2b5   :  { %v310_v33 = vadd.f32 %v2578_v31, %v309_v32   ;;  %v1956_v34 = vpop.f32.mrb[3].mxu0 }
 0x2b6 LB: > { %v2450_v35 = vmov 0.0|0.0   ;;  %vm2451_vm2 = vmmov 0   ;;  %v2452_v36 = vmov 0.0   ;;  %s325_s6 = ssub.f32 1.0, %s2441_s21  ;;  %v327_v37 = vmul.f32 0.2, %v2425_v33  ;;  %s2441_s21 = sphi %s2589_s21, %s2836_s21   ;;  %s2437_s5 = sphi %s2587_s5, %s1745_s5   ;;  %s2433_s4 = sphi %s2585_s4, %s2835_s4   ;;  %v2429_v11 = vphi %v72_v11, %v2834_v11   ;;  %v2425_v33 = vphi %v310_v33, %v1752_v33  }
 0x2b7   : > { %2173 = vmatprep.subr.bf16.mxu0 %v2450_v35  ;;  %1965 = vmatprep.mubr.msk.f32.mxu0 %vm2451_vm2, %v2452_v36  ;;  %v552_v51 = vmul.f32 0.075, %v2425_v33  ;;  %v778_v1 = vmul.f32 0.9777778, %v2425_v33  ;;  %v1006_v3 = vmul.f32 2.9525986, %v2425_v33 }
 0x2b8   : > { %2175 = vmatpush3.bf16.msra.mxu0 %v2526_v5  ;;  %2179 = vmatprep.subr.bf16.mxu1 %v2450_v35  ;;  %s2616_s22 = smin.f32 %s2437_s5, %s325_s6  ;;  %v1236_v6 = vmul.f32 2.8462753, %v2425_v33  ;;  %s2777_s4 = sadd.s32 1, %s2433_s4  }
 0x2b9   : > { %2176 = vmatprep.subr.bf16.mxu0 %v2450_v35  ;;  %2181 = vmatpush3.bf16.msra.mxu1 %v2531_v10  ;;  %v2620_v38 = vstv %s2616_s22  ;;  %s2831_s23 = smov %s2777_s4  ;;  %s1746_s26 = sadd.f32 %s2441_s21, %s2616_s22 }
 0x2ba   : > { %2182 = vmatprep.subr.bf16.mxu1 %v2450_v35  ;;  %1976 = vmatprep.mubr.msk.f32.mxu1 %vm2451_vm2, %v2452_v36  ;;  %v329_v39 = vmul.f32 %v2620_v38, %v327_v37  ;;  %s2453_s27 = smov 1e-20   ;;  %p320_p5 = scmp.lt.s32.totalorder %s2831_s23, 1000 }
 0x2bb   : > { %s2835_s4 = smov %s2831_s23 }
 0x2bc   : > { %2178 = vmatpush3.bf16.msra.mxu0 %v2529_v9  ;;  %v330_v40 = vadd.f32 %v2429_v11, %v329_v39 }
 0x2bd   : > { %2184 = vmatpush3.bf16.msra.mxu1 %v2540_v14  ;;  %2185 = vmatprep.subr.bf16.mxu0 %v2450_v35 }
 0x2be   : > { %2191 = vmatprep.subr.bf16.mxu1 %v2450_v35 }
 0x2bf   : > { %1966 = vmatmul.mubr.msk.f32.vlgmr.msra.gmra.mrb[0].mxu0 %vm79_vm1, %v330_v40 }
 0x2c0   : > { %2187 = vmatpush3.bf16.msra.mxu0 %v2549_v17  ;;  %1987 = vmatprep.mubr.msk.f32.mxu0 %vm2451_vm2, %v2452_v36 }
 0x2c1   : > { %2188 = vmatprep.subr.bf16.mxu0 %v2450_v35 }
 0x2c4   : > { %2190 = vmatpush3.bf16.msra.mxu0 %v2565_v25 }
 0x2c5   : > { %2197 = vmatprep.subr.bf16.mxu0 %v2450_v35 }
 0x392   : > { %v400_v41 = vpop.f32.mrb[0].mxu0 }
 0x393   : > { %v401_v42 = vadd.f32 %v2555_v18, %v400_v41  ;;  %v1967_v43 = vpop.f32.mrb[1].mxu0 }
 0x394   : > { %v1468_v43 = vmul.f32 0.091145836, %v2425_v33 }
 0x395   : > { %v404_v44 = vmax.f32 %v401_v42, 0.0 }
 0x397   : > { %1977 = vmatmul.mubr.msk.f32.vlgmr.msra.gmra.mrb[0].mxu1 %vm79_vm1, %v404_v44 }
 0x398   : > { %2193 = vmatpush3.bf16.msra.mxu1 %v2526_v5  ;;  %1998 = vmatprep.mubr.msk.f32.mxu1 %vm2451_vm2, %v2452_v36 }
 0x399   : > { %2194 = vmatprep.subr.bf16.mxu1 %v2450_v35 }
 0x39c   : > { %2196 = vmatpush3.bf16.msra.mxu1 %v2529_v9 }
 0x39d   : > { %2203 = vmatprep.subr.bf16.mxu1 %v2450_v35 }
 0x46a   : > { %v474_v45 = vpop.f32.mrb[0].mxu1 }
 0x46b   : > { %v475_v46 = vadd.f32 %v2571_v26, %v474_v45  ;;  %v1978_v47 = vpop.f32.mrb[1].mxu1 }
 0x46d   : > { %v478_v48 = vmax.f32 %v475_v46, 0.0  ;;  %v1700_v46 = vmul.f32 0.0012326388, %v2425_v33 }
 0x46f   : > { %1988 = vmatmul.mubr.msk.f32.vlgmr.msra.gmra.mrb[2].mxu0 %vm79_vm1, %v478_v48 }
 0x470   : > { %2199 = vmatpush3.bf16.msra.mxu0 %v2531_v10  ;;  %2009 = vmatprep.mubr.msk.f32.mxu0 %vm2451_vm2, %v2452_v36 }
 0x471   : > { %2200 = vmatprep.subr.bf16.mxu0 %v2450_v35 }
 0x474   : > { %2202 = vmatpush3.bf16.msra.mxu0 %v2540_v14 }
 0x475   : > { %2209 = vmatprep.subr.bf16.mxu0 %v2450_v35 }
 0x542   : > { %v548_v49 = vpop.f32.mrb[2].mxu0 }
 0x543   : > { %v549_v50 = vadd.f32 %v2578_v31, %v548_v49  ;;  %v1989_v52 = vpop.f32.mrb[3].mxu0 }
 0x545   : > { %v553_v53 = vmul.f32 0.225, %v549_v50  ;;  %v779_v2 = vmul.f32 -3.7333333, %v549_v50  ;;  %v1007_v4 = vmul.f32 -11.595794, %v549_v50 }
 0x546   : > { %v1237_v7 = vmul.f32 -10.757576, %v549_v50 }
 0x547   : > { %v554_v54 = vadd.f32 %v553_v53, %v552_v51  ;;  %v780_v15 = vadd.f32 %v779_v2, %v778_v1  ;;  %v1008_v16 = vadd.f32 %v1007_v4, %v1006_v3 }
 0x548   : > { %v1238_v19 = vadd.f32 %v1237_v7, %v1236_v6 }
 0x549   : > { %v555_v55 = vmul.f32 %v554_v54, %v2620_v38 }
 0x54b   : > { %v556_v56 = vadd.f32 %v2429_v11, %v555_v55 }
 0x54d   : > { %1999 = vmatmul.mubr.msk.f32.vlgmr.msra.gmra.mrb[2].mxu1 %vm79_vm1, %v556_v56 }
 0x54e   : > { %2205 = vmatpush3.bf16.msra.mxu1 %v2549_v17  ;;  %2020 = vmatprep.mubr.msk.f32.mxu1 %vm2451_vm2, %v2452_v36 }
 0x54f   : > { %2206 = vmatprep.subr.bf16.mxu1 %v2450_v35 }
 0x552   : > { %2208 = vmatpush3.bf16.msra.mxu1 %v2565_v25 }
 0x553   : > { %2215 = vmatprep.subr.bf16.mxu1 %v2450_v35 }
 0x620   : > { %v626_v57 = vpop.f32.mrb[2].mxu1 }
 0x621   : > { %v627_v58 = vadd.f32 %v2555_v18, %v626_v57  ;;  %v2000_v59 = vpop.f32.mrb[3].mxu1 }
 0x623   : > { %v630_v60 = vmax.f32 %v627_v58, 0.0 }
 0x625   : > { %2010 = vmatmul.mubr.msk.f32.vlgmr.msra.gmra.mrb[4].mxu0 %vm79_vm1, %v630_v60 }
 0x626   : > { %2211 = vmatpush3.bf16.msra.mxu0 %v2526_v5  ;;  %2031 = vmatprep.mubr.msk.f32.mxu0 %vm2451_vm2, %v2452_v36 }
 0x627   : > { %2212 = vmatprep.subr.bf16.mxu0 %v2450_v35 }
 0x62a   : > { %2214 = vmatpush3.bf16.msra.mxu0 %v2529_v9 }
 0x62b   : > { %2221 = vmatprep.subr.bf16.mxu0 %v2450_v35 }
 0x6f8   : > { %v700_v61 = vpop.f32.mrb[4].mxu0 }
 0x6f9   : > { %v701_v62 = vadd.f32 %v2571_v26, %v700_v61  ;;  %v2011_v63 = vpop.f32.mrb[5].mxu0 }
 0x6fb   : > { %v704_v0 = vmax.f32 %v701_v62, 0.0 }
 0x6fd   : > { %2021 = vmatmul.mubr.msk.f32.vlgmr.msra.gmra.mrb[4].mxu1 %vm79_vm1, %v704_v0 }
 0x6fe   : > { %2217 = vmatpush3.bf16.msra.mxu1 %v2531_v10  ;;  %2042 = vmatprep.mubr.msk.f32.mxu1 %vm2451_vm2, %v2452_v36 }
 0x6ff   : > { %2218 = vmatprep.subr.bf16.mxu1 %v2450_v35 }
 0x702   : > { %2220 = vmatpush3.bf16.msra.mxu1 %v2540_v14 }
 0x703   : > { %2227 = vmatprep.subr.bf16.mxu1 %v2450_v35 }
 0x7d0   : > { %v774_v8 = vpop.f32.mrb[4].mxu1 }
 0x7d1   : > { %v775_v12 = vadd.f32 %v2578_v31, %v774_v8  ;;  %v2022_v13 = vpop.f32.mrb[5].mxu1 }
 0x7d3   : > { %v781_v20 = vmul.f32 3.5555556, %v775_v12  ;;  %v1009_v21 = vmul.f32 9.822893, %v775_v12  ;;  %v1239_v22 = vmul.f32 8.906423, %v775_v12 }
 0x7d4   : > { %v1469_v44 = vmul.f32 0.4492363, %v775_v12  ;;  %v1701_v47 = vmul.f32 -0.0042527704, %v775_v12 }
 0x7d5   : > { %v782_v23 = vadd.f32 %v781_v20, %v780_v15  ;;  %v1010_v24 = vadd.f32 %v1009_v21, %v1008_v16  ;;  %v1240_v27 = vadd.f32 %v1239_v22, %v1238_v19 }
 0x7d6   : > { %v1470_v53 = vadd.f32 %v1469_v44, %v1468_v43  ;;  %v1702_v55 = vadd.f32 %v1701_v47, %v1700_v46 }
 0x7d7   : > { %v783_v28 = vmul.f32 %v782_v23, %v2620_v38 }
 0x7d9   : > { %v784_v29 = vadd.f32 %v2429_v11, %v783_v28 }
 0x7db   : > { %2032 = vmatmul.mubr.msk.f32.vlgmr.msra.gmra.mrb[6].mxu0 %vm79_vm1, %v784_v29 }
 0x7dc   : > { %2223 = vmatpush3.bf16.msra.mxu0 %v2549_v17  ;;  %2053 = vmatprep.mubr.msk.f32.mxu0 %vm2451_vm2, %v2452_v36 }
 0x7dd   : > { %2224 = vmatprep.subr.bf16.mxu0 %v2450_v35 }
 0x7e0   : > { %2226 = vmatpush3.bf16.msra.mxu0 %v2565_v25 }
 0x7e1   : > { %2233 = vmatprep.subr.bf16.mxu0 %v2450_v35 }
 0x8ae   : > { %v854_v30 = vpop.f32.mrb[6].mxu0 }
 0x8af   : > { %v855_v32 = vadd.f32 %v2555_v18, %v854_v30  ;;  %v2033_v34 = vpop.f32.mrb[7].mxu0 }
 0x8b1   : > { %v858_v37 = vmax.f32 %v855_v32, 0.0 }
 0x8b3   : > { %2043 = vmatmul.mubr.msk.f32.vlgmr.msra.gmra.mrb[6].mxu1 %vm79_vm1, %v858_v37 }
 0x8b4   : > { %2229 = vmatpush3.bf16.msra.mxu1 %v2526_v5  ;;  %2064 = vmatprep.mubr.msk.f32.mxu1 %vm2451_vm2, %v2452_v36 }
 0x8b5   : > { %2230 = vmatprep.subr.bf16.mxu1 %v2450_v35 }
 0x8b8   : > { %2232 = vmatpush3.bf16.msra.mxu1 %v2529_v9 }
 0x8b9   : > { %2239 = vmatprep.subr.bf16.mxu1 %v2450_v35 }
 0x986   : > { %v928_v39 = vpop.f32.mrb[6].mxu1 }
 0x987   : > { %v929_v40 = vadd.f32 %v2571_v26, %v928_v39  ;;  %v2044_v41 = vpop.f32.mrb[7].mxu1 }
 0x989   : > { %v932_v42 = vmax.f32 %v929_v40, 0.0 }
 0x98b   : > { %2054 = vmatmul.mubr.msk.f32.vlgmr.msra.gmra.mrb[8].mxu0 %vm79_vm1, %v932_v42 }
 0x98c   : > { %2235 = vmatpush3.bf16.msra.mxu0 %v2531_v10  ;;  %2075 = vmatprep.mubr.msk.f32.mxu0 %vm2451_vm2, %v2452_v36 }
 0x98d   : > { %2236 = vmatprep.subr.bf16.mxu0 %v2450_v35 }
 0x990   : > { %2238 = vmatpush3.bf16.msra.mxu0 %v2540_v14 }
 0x991   : > { %2245 = vmatprep.subr.bf16.mxu0 %v2450_v35 }
 0xa5e   : > { %v1002_v45 = vpop.f32.mrb[8].mxu0 }
 0xa5f   : > { %v1003_v48 = vadd.f32 %v2578_v31, %v1002_v45  ;;  %v2055_v49 = vpop.f32.mrb[9].mxu0 }
 0xa61   : > { %v1011_v50 = vmul.f32 -0.29080933, %v1003_v48  ;;  %v1241_v51 = vmul.f32 0.2784091, %v1003_v48  ;;  %v1471_v52 = vmul.f32 0.6510417, %v1003_v48 }
 0xa62   : > { %v1703_v54 = vmul.f32 0.036979165, %v1003_v48 }
 0xa63   : > { %v1012_v56 = vadd.f32 %v1011_v50, %v1010_v24  ;;  %v1242_v57 = vadd.f32 %v1241_v51, %v1240_v27  ;;  %v1472_v58 = vadd.f32 %v1471_v52, %v1470_v53 }
 0xa64   : > { %v1704_v59 = vadd.f32 %v1703_v54, %v1702_v55 }
 0xa65   : > { %v1013_v60 = vmul.f32 %v1012_v56, %v2620_v38 }
 0xa67   : > { %v1014_v61 = vadd.f32 %v2429_v11, %v1013_v60 }
 0xa69   : > { %2065 = vmatmul.mubr.msk.f32.vlgmr.msra.gmra.mrb[8].mxu1 %vm79_vm1, %v1014_v61 }
 0xa6a   : > { %2241 = vmatpush3.bf16.msra.mxu1 %v2549_v17  ;;  %2086 = vmatprep.mubr.msk.f32.mxu1 %vm2451_vm2, %v2452_v36 }
 0xa6b   : > { %2242 = vmatprep.subr.bf16.mxu1 %v2450_v35 }
 0xa6e   : > { %2244 = vmatpush3.bf16.msra.mxu1 %v2565_v25 }
 0xa6f   : > { %2251 = vmatprep.subr.bf16.mxu1 %v2450_v35 }
 0xb3c   : > { %v1084_v62 = vpop.f32.mrb[8].mxu1 }
 0xb3d   : > { %v1085_v63 = vadd.f32 %v2555_v18, %v1084_v62  ;;  %v2066_v0 = vpop.f32.mrb[9].mxu1 }
 0xb3f   : > { %v1088_v1 = vmax.f32 %v1085_v63, 0.0 }
 0xb41   : > { %2076 = vmatmul.mubr.msk.f32.vlgmr.msra.gmra.mrb[10].mxu0 %vm79_vm1, %v1088_v1 }
 0xb42   : > { %2247 = vmatpush3.bf16.msra.mxu0 %v2526_v5  ;;  %2097 = vmatprep.mubr.msk.f32.mxu0 %vm2451_vm2, %v2452_v36 }
 0xb43   : > { %2248 = vmatprep.subr.bf16.mxu0 %v2450_v35 }
 0xb46   : > { %2250 = vmatpush3.bf16.msra.mxu0 %v2529_v9 }
 0xb47   : > { %2257 = vmatprep.subr.bf16.mxu0 %v2450_v35 }
 0xc14   : > { %v1158_v2 = vpop.f32.mrb[10].mxu0 }
 0xc15   : > { %v1159_v3 = vadd.f32 %v2571_v26, %v1158_v2  ;;  %v2077_v4 = vpop.f32.mrb[11].mxu0 }
 0xc17   : > { %v1162_v6 = vmax.f32 %v1159_v3, 0.0 }
 0xc19   : > { %2087 = vmatmul.mubr.msk.f32.vlgmr.msra.gmra.mrb[10].mxu1 %vm79_vm1, %v1162_v6 }
 0xc1a   : > { %2253 = vmatpush3.bf16.msra.mxu1 %v2531_v10  ;;  %2108 = vmatprep.mubr.msk.f32.mxu1 %vm2451_vm2, %v2452_v36 }
 0xc1b   : > { %2254 = vmatprep.subr.bf16.mxu1 %v2450_v35 }
 0xc1e   : > { %2256 = vmatpush3.bf16.msra.mxu1 %v2540_v14 }
 0xc1f   : > { %2263 = vmatprep.subr.bf16.mxu1 %v2450_v35 }
 0xcec   : > { %v1232_v7 = vpop.f32.mrb[10].mxu1 }
 0xced   : > { %v1233_v8 = vadd.f32 %v2578_v31, %v1232_v7  ;;  %v2088_v12 = vpop.f32.mrb[11].mxu1 }
 0xcef   : > { %v1243_v13 = vmul.f32 -0.27353132, %v1233_v8  ;;  %v1473_v15 = vmul.f32 -0.3223762, %v1233_v8  ;;  %v1705_v16 = vmul.f32 -0.0508638, %v1233_v8 }
 0xcf1   : > { %v1244_v19 = vadd.f32 %v1243_v13, %v1242_v57  ;;  %v1474_v20 = vadd.f32 %v1473_v15, %v1472_v58  ;;  %v1706_v21 = vadd.f32 %v1705_v16, %v1704_v59 }
 0xcf3   : > { %v1245_v22 = vmul.f32 %v1244_v19, %v2620_v38 }
 0xcf5   : > { %v1246_v23 = vadd.f32 %v2429_v11, %v1245_v22 }
 0xcf7   : > { %2098 = vmatmul.mubr.msk.f32.vlgmr.msra.gmra.mrb[12].mxu0 %vm79_vm1, %v1246_v23 }
 0xcf8   : > { %2259 = vmatpush3.bf16.msra.mxu0 %v2549_v17  ;;  %2119 = vmatprep.mubr.msk.f32.mxu0 %vm2451_vm2, %v2452_v36 }
 0xcf9   : > { %2260 = vmatprep.subr.bf16.mxu0 %v2450_v35 }
 0xcfc   : > { %2262 = vmatpush3.bf16.msra.mxu0 %v2565_v25 }
 0xcfd   : > { %2269 = vmatprep.subr.bf16.mxu0 %v2450_v35 }
 0xdca   : > { %v1316_v24 = vpop.f32.mrb[12].mxu0 }
 0xdcb   : > { %v1317_v27 = vadd.f32 %v2555_v18, %v1316_v24  ;;  %v2099_v28 = vpop.f32.mrb[13].mxu0 }
 0xdcd   : > { %v1320_v29 = vmax.f32 %v1317_v27, 0.0 }
 0xdcf   : > { %2109 = vmatmul.mubr.msk.f32.vlgmr.msra.gmra.mrb[12].mxu1 %vm79_vm1, %v1320_v29 }
 0xdd0   : > { %2265 = vmatpush3.bf16.msra.mxu1 %v2526_v5  ;;  %2130 = vmatprep.mubr.msk.f32.mxu1 %vm2451_vm2, %v2452_v36 }
 0xdd1   : > { %2266 = vmatprep.subr.bf16.mxu1 %v2450_v35 }
 0xdd4   : > { %2268 = vmatpush3.bf16.msra.mxu1 %v2529_v9 }
 0xdd5   : > { %2275 = vmatprep.subr.bf16.mxu1 %v2450_v35 }
 0xea2   : > { %v1390_v30 = vpop.f32.mrb[12].mxu1 }
 0xea3   : > { %v1391_v32 = vadd.f32 %v2571_v26, %v1390_v30  ;;  %v2110_v34 = vpop.f32.mrb[13].mxu1 }
 0xea5   : > { %v1394_v37 = vmax.f32 %v1391_v32, 0.0 }
 0xea7   : > { %2120 = vmatmul.mubr.msk.f32.vlgmr.msra.gmra.mrb[14].mxu0 %vm79_vm1, %v1394_v37 }
 0xea8   : > { %2271 = vmatpush3.bf16.msra.mxu0 %v2531_v10  ;;  %2141 = vmatprep.mubr.msk.f32.mxu0 %vm2451_vm2, %v2452_v36 }
 0xea9   : > { %2272 = vmatprep.subr.bf16.mxu0 %v2450_v35 }
 0xeac   : > { %2274 = vmatpush3.bf16.msra.mxu0 %v2540_v14 }
 0xf7a   : > { %v1464_v39 = vpop.f32.mrb[14].mxu0 }
 0xf7b   : > { %v1465_v40 = vadd.f32 %v2578_v31, %v1464_v39  ;;  %v2121_v41 = vpop.f32.mrb[15].mxu0 }
 0xf7d   : > { %v1475_v42 = vmul.f32 0.13095239, %v1465_v40  ;;  %v1707_v43 = vmul.f32 0.041904762, %v1465_v40 }
 0xf7f   : > { %v1476_v44 = vadd.f32 %v1475_v42, %v1474_v20  ;;  %v1708_v45 = vadd.f32 %v1707_v43, %v1706_v21 }
 0xf81   : > { %v1477_v46 = vmul.f32 %v1476_v44, %v2620_v38 }
 0xf83   : > { %v1478_v47 = vadd.f32 %v2429_v11, %v1477_v46 }
 0xf85   : > { %2131 = vmatmul.mubr.msk.f32.vlgmr.msra.gmra.mrb[14].mxu1 %vm79_vm1, %v1478_v47  ;;  %v1713_v56 = vand.u32 2147483647, %v1478_v47 }
 0xf86   : > { %2277 = vmatpush3.bf16.msra.mxu1 %v2549_v17  ;;  %2152 = vmatprep.mubr.msk.f32.mxu1 %vm2451_vm2, %v2452_v36  ;;  %v1712_v36 = vand.u32 2147483647, %v2429_v11 }
 0xf87   : > { %2278 = vmatprep.subr.bf16.mxu1 %v2450_v35 }
 0xf88   : > { %v1714_v35 = vmax.f32.f32 %v1712_v36, %v1713_v56 }
 0xf8a   : > { %2280 = vmatpush3.bf16.msra.mxu1 %v2565_v25  ;;  %v1715_v57 = vmul.f32 0.001, %v1714_v35 }
 0xf8c   : > { %v1716_v58 = vadd.f32 0.001, %v1715_v57 }
 0xf8e   : > { %2337 = vrcp.f32 %v1716_v58 }
 0xf98   : > { %v2338_v1 = vpop.eup %2337 }
0x1058   : > { %v1548_v48 = vpop.f32.mrb[14].mxu1 }
0x1059   : > { %v1549_v49 = vadd.f32 %v2555_v18, %v1548_v48  ;;  %v2132_v50 = vpop.f32.mrb[15].mxu1 }
0x105b   : > { %v1552_v51 = vmax.f32 %v1549_v49, 0.0 }
0x105d   : > { %2142 = vmatmul.mubr.msk.f32.vlgmr.msra.gmra.mrb[16].mxu0 %vm79_vm1, %v1552_v51 }
0x1130   : > { %v1622_v52 = vpop.f32.mrb[16].mxu0 }
0x1131   : > { %v1623_v53 = vadd.f32 %v2571_v26, %v1622_v52  ;;  %v2143_v54 = vpop.f32.mrb[17].mxu0 }
0x1133   : > { %v1626_v55 = vmax.f32 %v1623_v53, 0.0 }
0x1135   : > { %2153 = vmatmul.mubr.msk.f32.vlgmr.msra.gmra.mrb[16].mxu1 %vm79_vm1, %v1626_v55 }
0x1208   : > { %v1696_v59 = vpop.f32.mrb[16].mxu1 }
0x1209   : > { %v1697_v60 = vadd.f32 %v2578_v31, %v1696_v59  ;;  %v2154_v61 = vpop.f32.mrb[17].mxu1 }
0x120b   : > { %v1709_v62 = vmul.f32 -0.025, %v1697_v60 }
0x120d   : > { %v1710_v63 = vadd.f32 %v1709_v62, %v1708_v45 }
0x120f   : > { %v1711_v0 = vmul.f32 %v1710_v63, %v2620_v38 }
0x1211   : > { %v1718_v2 = vmul.f32 %v2338_v1, %v1711_v0 }
0x1213   : > { %v1719_v3 = vmul.f32 %v1718_v2, %v1718_v2 }
0x1215   : > { %v1720_v4 = vsel %vm79_vm1, %v1719_v3, 0.0 }
0x1216   : > { %1721 = vadd.xlane.f32.xlu0 %v1720_v4 }
0x12a3   : > { %v1722_v6 = vpop.xlane.xlu0 %1721 }
0x12a4   : > { %v1723_v7 = vrot.slane %v1722_v6, 4 }
0x12a6   : > { %v1724_v8 = vadd.f32 %v1723_v7, %v1722_v6 }
0x12a8   : > { %v1725_v12 = vrot.slane %v1724_v8, 2 }
0x12aa   : > { %v1726_v13 = vadd.f32 %v1725_v12, %v1724_v8 }
0x12ac   : > { %v1727_v15 = vrot.slane %v1726_v13, 1 }
0x12ae   : > { %v1728_v16 = vadd.f32 %v1727_v15, %v1726_v13 }
0x12b0   : > { %2281 = vpush %v1728_v16 }
0x12e1   : > { %s2282_s24 = spop %2281 }
0x12e2   : > { %s1730_s25 = smul.f32 0.00390625, %s2282_s24 }
0x12e4   : > { %p1731_p2 = scmp.le.f32.partialorder %s1730_s25, 1.0  ;;  %s1732_s29 = smax.f32 %s2453_s27, %s1730_s25 }
0x12e5   : > { %v1733_v38 = vstv %s1732_s29  ;;  %p1742_p3 = scmp.le.f32.partialorder %s1730_s25, 3e+38 }
0x12e6   : > { %2339 = vlog2.f32 %v1733_v38  ;;  %s2838_s26 = smov (!%p1731_p2, %s1746_s26), %s2441_s21 }
0x12e7   : > { %s1748_s1 = scalar_select %p1731_p2, 1, 0 }
0x12e8   : > { %p319_p4 = scmp.lt.f32.partialorder %s2838_s26, 0.999999  ;;  %s2836_s21 = smov %s2838_s26 }
0x12e9   : > { %v1749_v19 = vstv %s1748_s1 }
0x12ea   : > { %vm2782_vm3 = vcmp.eq.s32.totalorder %v1749_v19, 1  ;;  %p321_p6 = pnand %p320_p5, %p319_p4 }
0x12eb   : > { %v1751_v21 = vsel %vm2782_vm3, %v1478_v47, %v2429_v11   ;;  %v1752_v33 = vsel %vm2782_vm3, %v1697_v60, %v2425_v33   ;;  %1756 = sst [smem:[#allocation7]] (%p321_p6), %s2831_s23  ;;  %s2387_s11 = scalar_lea.hbm (%p321_p6), %s2830_s8, 16 }
0x12ec   : > { %v2834_v11 = vmov %v1751_v21  ;;  %1754 = vst.msk [vmem:[%s2829_s7] sm:$0xff] (%p321_p6), %vm79_vm1, %v1751_v21  ;;  %p2388_p7 = scmp.ne.s32.totalorder (%p321_p6), %s2830_s8, %s2387_s11  ;;  %p2391_p8 = scmp.lt.u32.totalorder (%p321_p6), %s2387_s11, %s2830_s8 }
0x12ee   :  { %p2393_p9 = pnand (%p321_p6), %p2391_p8, %p2388_p7 }
0x12f0   : > { %v2340_v22 = vpop.eup %2339 }
0x12f1   : > { %v1735_v23 = vmul.f32 0.6931472, %v2340_v22 }
0x12f3   : > { %v1736_v24 = vmul.f32 -0.1, %v1735_v23 }
0x12f5   : > { %v1737_v27 = vmul.f32 1.442695, %v1736_v24 }
0x12f7   : > { %2341 = vpow2.f32 %v1737_v27 }
0x1301   : > { %v2342_v28 = vpop.eup %2341 }
0x1302   : > { %v1739_v29 = vmul.f32 0.9, %v2342_v28 }
0x1304   : > { %v1740_v30 = vmax.f32 %v1739_v29, 0.2 }
0x1306   : > { %v1741_v32 = vmin.f32 %v1740_v30, 10.0 }
0x1308   : > { %2283 = vpush %v1741_v32 }
0x1335   :  { %324 = sbr.rel (!%p321_p6) target bundleno = 694 (0x2b6), region = 72 }
0x1339   : > { %s2284_s28 = spop %2283 }
0x133a   : > { %s2840_s28 = smov (!%p1742_p3, %s2284_s28), 0.2 }
0x133b   : > { %s1745_s5 = smul.f32 %s2840_s28, %s2616_s22  }
0x133c   :  { %2396 = shalt.err (!%p2393_p9)
}
0x133d   :  { %s2454_s15 = smov [#allocation7]  }
0x133e   :  { %1766 = dma.smem_to_hbm %s2454_s15, 16, %s2830_s8, [#allocation4]  }
0x133f   :  { %2421 = dma.done.wait [#allocation4], 16  }
0x1340   :  { %2422 = vsyncadd [#allocation4], 4294967280 }
0x1341   :  { %1772 = sfence }
0x1342   :  { %1773 = vsyncpa [#allocation3], 1 }
0x1343   :  { %1774 = vsyncpa [#allocation6], 1 }
0x1344   :  { %1775 = vsyncpa [#allocation4], 1 }

</bundles_post_ra>
